<compile_context>
chip_gen: v7x
topology: tpu7x:2x2x1
jax: 0.10.0
libtpu: 0.0.40
codegen_flags: <defaults>
</compile_context>

<pallas_src>
import functools

import jax
import jax.numpy as jnp
from jax.experimental import pallas as pl
from jax.experimental.pallas import tpu as pltpu


def basic_block_kernel(x_ref, w1_ref, w2_ref, b1_ref, b2_ref, o_ref, *, H):
    """One batched block of images per grid step, lane-dense layout.

    x_ref  : (TM, WC)    bf16  TM = nb*H rows of nb stacked images, WC = W*C
    w1_ref : (3*WC, WC)  bf16  K-fused banded conv1 weights (BN1 scale folded)
    w2_ref : (3*WC, WC)  bf16  K-fused banded conv2 weights (BN2 scale folded)
    b1_ref : (1, WC)     f32   BN1 bias, pre-broadcast to a lane row
    b2_ref : (1, WC)     f32   BN2 bias, pre-broadcast to a lane row
    o_ref  : (TM, WC)    f32   output
    """
    x = x_ref[...].astype(jnp.float32)                 # (TM, WC) f32
    TM, WC = x.shape

    # Per-image edge masks, computed once per grid step.  (row % H) semantics
    # implement the 3x3 conv's H-direction zero padding AND prevent the
    # sublane roll from leaking rows across image boundaries within the block.
    row = jax.lax.broadcasted_iota(jnp.int32, (TM, WC), 0) % H
    not_first = row > 0          # rows where reading row h-1 is in-bounds
    not_last = row < H - 1       # rows where reading row h+1 is in-bounds

    def conv3x3(inp, w_ref):
        # down[h] = inp[h-1]  (dy = 0 tap): roll rows down by 1.
        down = jnp.where(not_first, pltpu.roll(inp, shift=1, axis=0), 0.0)
        # up[h]   = inp[h+1]  (dy = 2 tap): roll "up by 1" expressed as a
        # NON-NEGATIVE downward roll by TM-1 (pltpu.roll rejects negatives).
        up = jnp.where(not_last, pltpu.roll(inp, shift=TM - 1, axis=0), 0.0)
        # Fuse the three vertical taps along K: one (TM, 3*WC) x (3*WC, WC)
        # MXU pass per conv instead of three K=WC passes + two VPU adds.
        lhs = jnp.concatenate([down, inp, up], axis=-1)          # (TM, 3*WC)
        return jnp.dot(lhs.astype(jnp.bfloat16), w_ref[...],
                       preferred_element_type=jnp.float32)       # (TM, WC) f32

    h1 = jnp.maximum(conv3x3(x, w1_ref) + b1_ref[...], 0.0)      # conv1+bn1+relu
    h2 = conv3x3(h1, w2_ref) + b2_ref[...]                       # conv2+bn2
    o_ref[...] = jnp.maximum(h2 + x, 0.0).astype(o_ref.dtype)    # +identity, relu


def _build_band_weights(w_hwio, scale, W):
    """K-fused banded weight matrix for the lane-dense layout.

    w_hwio: (3, 3, C, P) conv weights (HWIO); scale: (P,) folded BN scale.
    Returns (3*W*C, W*P) with the three dy taps stacked along the contraction
    axis in [dy=0, dy=1, dy=2] order (matching [down, center, up]) and
        band[dy, w_in*C + c, w_out*P + p] = w[dy, w_in - w_out + 1, c, p]
    zero outside the 3-tap band (W-direction zero padding comes for free).
    """
    kh, kw, C, P = w_hwio.shape
    w = w_hwio * scale[None, None, None, :]                  # fold BN scale
    w_in = jnp.arange(W)[:, None]
    w_out = jnp.arange(W)[None, :]
    dx = w_in - w_out + 1                                    # (W, W)
    valid = (dx >= 0) & (dx < kw)
    dxc = jnp.clip(dx, 0, kw - 1)
    band = jnp.where(valid[None, :, :, None, None], w[:, dxc], 0.0)  # (3,W,W,C,P)
    band = band.transpose(0, 1, 3, 2, 4).reshape(kh, W * C, W * P)
    return band.reshape(kh * W * C, W * P)                   # (3*WC, WP)


def _pick_batch_tile(N, H, max_rows=512):
    """Pick nb images per grid step: largest divisor of N with nb*H <= max_rows
    (MXU M sweet spot).  If the grid collapses to one step but a >=2-step grid
    can still keep M >= 128, prefer that so v7x's two TensorCores both work."""
    divs = [d for d in range(1, N + 1) if N % d == 0]
    fit = [d for d in divs if d * H <= max_rows] or [1]
    nb = max(fit)
    if N // nb < 2:
        alt = [d for d in fit if N // d >= 2 and d * H >= 128]
        if alt:
            nb = max(alt)
    return nb


def basic_block_lane_dense(x_flat, band1, band2, bias1, bias2, *,
                           N, H, batch_tile=None):
    """Lane-dense entry: x_flat is (N*H, WC) bf16, returns (N*H, WC) f32.

    Production use keeps activations in this layout across blocks and folds
    the BN/conv params once, avoiding per-call NCHW<->NHWC transposes.
    """
    total_rows, WC = x_flat.shape
    assert total_rows == N * H
    nb = _pick_batch_tile(N, H) if batch_tile is None else batch_tile
    assert N % nb == 0
    TM = nb * H

    return pl.pallas_call(
        functools.partial(basic_block_kernel, H=H),
        out_shape=jax.ShapeDtypeStruct((N * H, WC), jnp.float32),
        grid_spec=pltpu.PrefetchScalarGridSpec(
            num_scalar_prefetch=0,
            grid=(N // nb,),
            in_specs=[
                pl.BlockSpec((TM, WC), lambda n: (n, 0)),
                # Constant block index -> pipeline keeps weights resident
                # (no per-step re-DMA of the 96 KiB bands).
                pl.BlockSpec((3 * WC, WC), lambda n: (0, 0)),
                pl.BlockSpec((3 * WC, WC), lambda n: (0, 0)),
                pl.BlockSpec((1, WC), lambda n: (0, 0)),
                pl.BlockSpec((1, WC), lambda n: (0, 0)),
            ],
            out_specs=pl.BlockSpec((TM, WC), lambda n: (n, 0)),
        ),
        compiler_params=pltpu.CompilerParams(
            dimension_semantics=("parallel",)),   # v7x: 2 TCs split the grid
    )(x_flat, band1, band2, bias1, bias2)


def basic_block_forward(x_nchw, w1_oihw, w2_oihw,
                        bn1_params, bn2_params, eps=1e-5, batch_tile=None):
    """PyTorch-convention wrapper: NCHW / OIHW in, NCHW out."""
    g1, be1, m1, v1 = bn1_params
    g2, be2, m2, v2 = bn2_params

    # Fold BatchNorm (inference) into per-channel scale/bias.
    s1 = g1 / jnp.sqrt(v1 + eps)
    b1 = be1 - m1 * s1
    s2 = g2 / jnp.sqrt(v2 + eps)
    b2 = be2 - m2 * s2

    x = jnp.transpose(x_nchw, (0, 2, 3, 1)).astype(jnp.float32)    # NHWC
    N, H, W, C = x.shape
    P = w1_oihw.shape[0]
    assert C == P, "BasicBlock with downsample=None requires inplanes == planes"
    WC = W * C

    w1 = jnp.transpose(w1_oihw, (2, 3, 1, 0)).astype(jnp.float32)  # HWIO
    w2 = jnp.transpose(w2_oihw, (2, 3, 1, 0)).astype(jnp.float32)

    # BN scale folded into K-fused banded conv weights; bf16 MXU operands.
    band1 = _build_band_weights(w1, s1, W).astype(jnp.bfloat16)    # (3*WC, WC)
    band2 = _build_band_weights(w2, s2, W).astype(jnp.bfloat16)
    bias1 = jnp.tile(b1, W).reshape(1, WC).astype(jnp.float32)     # lane rows
    bias2 = jnp.tile(b2, W).reshape(1, WC).astype(jnp.float32)

    # Lane-dense bf16 activation slab (halves input HBM bytes).
    x_flat = x.reshape(N * H, WC).astype(jnp.bfloat16)

    out_flat = basic_block_lane_dense(x_flat, band1, band2, bias1, bias2,
                                      N=N, H=H, batch_tile=batch_tile)

    out = out_flat.reshape(N, H, W, P)
    return jnp.transpose(out, (0, 3, 1, 2))   # back to NCHW


def _reference_forward(x_nchw, w1, w2, bn1_params, bn2_params, eps=1e-5):
    """Pure-JAX f32 reference (lax.conv) for a correctness check."""
    g1, be1, m1, v1 = bn1_params
    g2, be2, m2, v2 = bn2_params

    def conv(x, w):
        return jax.lax.conv_general_dilated(
            x, w, window_strides=(1, 1), padding=((1, 1), (1, 1)),
            dimension_numbers=("NCHW", "OIHW", "NCHW"))

    def bn(x, g, b, m, v):
        g, b, m, v = (a.reshape(1, -1, 1, 1) for a in (g, b, m, v))
        return (x - m) / jnp.sqrt(v + eps) * g + b

    out = jax.nn.relu(bn(conv(x_nchw, w1), g1, be1, m1, v1))
    out = bn(conv(out, w2), g2, be2, m2, v2)
    return jax.nn.relu(out + x_nchw)


if __name__ == "__main__":
    N, C, H, W = 2, 8, 16, 16          # inplanes == planes == 8, stride=1; W*C=128
    key = jax.random.PRNGKey(0)
    kx, kw1, kw2, kg1, kb1, km1, kv1, kg2, kb2, km2, kv2 = jax.random.split(key, 11)

    x = jax.random.normal(kx, (N, C, H, W), jnp.float32)
    w1 = 0.1 * jax.random.normal(kw1, (C, C, 3, 3), jnp.float32)   # OIHW
    w2 = 0.1 * jax.random.normal(kw2, (C, C, 3, 3), jnp.float32)   # OIHW

    bn1 = (1.0 + 0.1 * jax.random.normal(kg1, (C,), jnp.float32),     # gamma
           0.1 * jax.random.normal(kb1, (C,), jnp.float32),           # beta
           0.1 * jax.random.normal(km1, (C,), jnp.float32),           # running_mean
           0.5 + jnp.abs(jax.random.normal(kv1, (C,), jnp.float32)))  # running_var
    bn2 = (1.0 + 0.1 * jax.random.normal(kg2, (C,), jnp.float32),
           0.1 * jax.random.normal(kb2, (C,), jnp.float32),
           0.1 * jax.random.normal(km2, (C,), jnp.float32),
           0.5 + jnp.abs(jax.random.normal(kv2, (C,), jnp.float32)))

    out = jax.block_until_ready(basic_block_forward(x, w1, w2, bn1, bn2))
    ref = jax.block_until_ready(_reference_forward(x, w1, w2, bn1, bn2))

    assert out.shape == (N, C, H, W)
    # bf16 MXU operands + bf16 activation transport (f32 accumulation)
    # -> loosened tolerance vs the f32 reference.
    err = float(jnp.max(jnp.abs(out - ref)))
    assert jnp.allclose(out, ref, rtol=5e-2, atol=5e-2), err

    print("KERNEL_OK")
</pallas_src>

<mosaic_0001>
module attributes {stable_mosaic.version = 11 : i64} {
  func.func @basic_block_kernel(%arg0: i32, %arg1: memref<32x128xbf16, #tpu.memory_space<vmem>>, %arg2: memref<384x128xbf16, #tpu.memory_space<vmem>>, %arg3: memref<384x128xbf16, #tpu.memory_space<vmem>>, %arg4: memref<1x128xf32, #tpu.memory_space<vmem>>, %arg5: memref<1x128xf32, #tpu.memory_space<vmem>>, %arg6: memref<32x128xf32, #tpu.memory_space<vmem>>) attributes {dimension_semantics = [#tpu.dimension_semantics<parallel>], iteration_bounds = array<i64: 1>, scalar_prefetch = 0 : i64, scratch_operands = 0 : i64, tpu.core_type = #tpu.core_type<tc>, window_params = [{transform_indices = @transform_0, window_bounds = array<i64: 32, 128>}, {pipeline_mode = #tpu.pipeline_mode<synchronous>, transform_indices = @transform_1, window_bounds = array<i64: 384, 128>}, {pipeline_mode = #tpu.pipeline_mode<synchronous>, transform_indices = @transform_2, window_bounds = array<i64: 384, 128>}, {pipeline_mode = #tpu.pipeline_mode<synchronous>, transform_indices = @transform_3, window_bounds = array<i64: 1, 128>}, {pipeline_mode = #tpu.pipeline_mode<synchronous>, transform_indices = @transform_4, window_bounds = array<i64: 1, 128>}, {transform_indices = @transform_5, window_bounds = array<i64: 32, 128>}]} {
    %c0 = arith.constant 0 : index
    %c0_0 = arith.constant 0 : index
    %0 = vector.load %arg1[%c0, %c0_0] : memref<32x128xbf16, #tpu.memory_space<vmem>>, vector<32x128xbf16>
    %1 = arith.extf %0 : vector<32x128xbf16> to vector<32x128xf32>
    %2 = tpu.iota {dimensions = array<i32: 0>} : vector<32x128xi32>
    %c16_i32 = arith.constant 16 : i32
    %c0_i32 = arith.constant 0 : i32
    %3 = arith.cmpi eq, %c16_i32, %c0_i32 : i32
    %c1_i32 = arith.constant 1 : i32
    %4 = arith.select %3, %c1_i32, %c16_i32 : i32
    %5 = vector.broadcast %4 : i32 to vector<32x128xi32>
    %6 = arith.remsi %2, %5 : vector<32x128xi32>
    %c0_i32_1 = arith.constant 0 : i32
    %7 = vector.broadcast %c0_i32_1 : i32 to vector<32x128xi32>
    %8 = arith.cmpi ne, %6, %7 : vector<32x128xi32>
    %c0_i32_2 = arith.constant 0 : i32
    %9 = vector.broadcast %c0_i32_2 : i32 to vector<32x128xi32>
    %10 = arith.cmpi slt, %6, %9 : vector<32x128xi32>
    %c0_i32_3 = arith.constant 0 : i32
    %11 = arith.cmpi slt, %4, %c0_i32_3 : i32
    %12 = vector.broadcast %11 : i1 to vector<32x128xi1>
    %13 = vector.broadcast %12 : vector<32x128xi1> to vector<32x128xi1>
    %14 = arith.xori %10, %13 : vector<32x128xi1>
    %15 = arith.andi %14, %8 : vector<32x128xi1>
    %16 = vector.broadcast %4 : i32 to vector<32x128xi32>
    %17 = arith.addi %6, %16 : vector<32x128xi32>
    %18 = arith.select %15, %17, %6 : vector<32x128xi1>, vector<32x128xi32>
    %c0_i32_4 = arith.constant 0 : i32
    %19 = vector.broadcast %c0_i32_4 : i32 to vector<32x128xi32>
    %20 = arith.cmpi sgt, %18, %19 : vector<32x128xi32>
    %c15_i32 = arith.constant 15 : i32
    %21 = vector.broadcast %c15_i32 : i32 to vector<32x128xi32>
    %22 = arith.cmpi slt, %18, %21 : vector<32x128xi32>
    %c1_i32_5 = arith.constant 1 : i32
    %23 = tpu.dynamic_rotate %1 by %c1_i32_5 dim 0 : vector<32x128xf32>, i32 -> vector<32x128xf32>
    %cst = arith.constant 0.000000e+00 : f32
    %24 = vector.broadcast %cst : f32 to vector<32x128xf32>
    %25 = arith.select %20, %23, %24 : vector<32x128xi1>, vector<32x128xf32>
    %c31_i32 = arith.constant 31 : i32
    %26 = tpu.dynamic_rotate %1 by %c31_i32 dim 0 : vector<32x128xf32>, i32 -> vector<32x128xf32>
    %cst_6 = arith.constant 0.000000e+00 : f32
    %27 = vector.broadcast %cst_6 : f32 to vector<32x128xf32>
    %28 = arith.select %22, %26, %27 : vector<32x128xi1>, vector<32x128xf32>
    %29 = tpu.concatenate %25, %1, %28 in 1 : vector<32x128xf32>, vector<32x128xf32>, vector<32x128xf32> -> vector<32x384xf32>
    %30 = arith.truncf %29 : vector<32x384xf32> to vector<32x384xbf16>
    %c0_7 = arith.constant 0 : index
    %c0_8 = arith.constant 0 : index
    %31 = vector.load %arg2[%c0_7, %c0_8] : memref<384x128xbf16, #tpu.memory_space<vmem>>, vector<384x128xbf16>
    %cst_9 = arith.constant dense<0.000000e+00> : vector<32x128xf32>
    %32 = tpu.matmul %30, %31, %cst_9 {dimension_numbers = #tpu.dot_dimension_numbers<[1], [0], [0], [1], [0, 0, 1, 1], [], []>} : vector<32x384xbf16>, vector<384x128xbf16>, vector<32x128xf32> -> vector<32x128xf32>
    %c0_10 = arith.constant 0 : index
    %c0_11 = arith.constant 0 : index
    %33 = vector.load %arg4[%c0_10, %c0_11] : memref<1x128xf32, #tpu.memory_space<vmem>>, vector<1x128xf32>
    %34 = vector.broadcast %33 : vector<1x128xf32> to vector<32x128xf32>
    %35 = arith.addf %32, %34 : vector<32x128xf32>
    %cst_12 = arith.constant 0.000000e+00 : f32
    %36 = vector.broadcast %cst_12 : f32 to vector<32x128xf32>
    %37 = arith.maximumf %35, %36 : vector<32x128xf32>
    %c1_i32_13 = arith.constant 1 : i32
    %38 = tpu.dynamic_rotate %37 by %c1_i32_13 dim 0 : vector<32x128xf32>, i32 -> vector<32x128xf32>
    %cst_14 = arith.constant 0.000000e+00 : f32
    %39 = vector.broadcast %cst_14 : f32 to vector<32x128xf32>
    %40 = arith.select %20, %38, %39 : vector<32x128xi1>, vector<32x128xf32>
    %c31_i32_15 = arith.constant 31 : i32
    %41 = tpu.dynamic_rotate %37 by %c31_i32_15 dim 0 : vector<32x128xf32>, i32 -> vector<32x128xf32>
    %cst_16 = arith.constant 0.000000e+00 : f32
    %42 = vector.broadcast %cst_16 : f32 to vector<32x128xf32>
    %43 = arith.select %22, %41, %42 : vector<32x128xi1>, vector<32x128xf32>
    %44 = tpu.concatenate %40, %37, %43 in 1 : vector<32x128xf32>, vector<32x128xf32>, vector<32x128xf32> -> vector<32x384xf32>
    %45 = arith.truncf %44 : vector<32x384xf32> to vector<32x384xbf16>
    %c0_17 = arith.constant 0 : index
    %c0_18 = arith.constant 0 : index
    %46 = vector.load %arg3[%c0_17, %c0_18] : memref<384x128xbf16, #tpu.memory_space<vmem>>, vector<384x128xbf16>
    %cst_19 = arith.constant dense<0.000000e+00> : vector<32x128xf32>
    %47 = tpu.matmul %45, %46, %cst_19 {dimension_numbers = #tpu.dot_dimension_numbers<[1], [0], [0], [1], [0, 0, 1, 1], [], []>} : vector<32x384xbf16>, vector<384x128xbf16>, vector<32x128xf32> -> vector<32x128xf32>
    %c0_20 = arith.constant 0 : index
    %c0_21 = arith.constant 0 : index
    %48 = vector.load %arg5[%c0_20, %c0_21] : memref<1x128xf32, #tpu.memory_space<vmem>>, vector<1x128xf32>
    %49 = vector.broadcast %48 : vector<1x128xf32> to vector<32x128xf32>
    %50 = arith.addf %47, %49 : vector<32x128xf32>
    %51 = arith.addf %50, %1 : vector<32x128xf32>
    %cst_22 = arith.constant 0.000000e+00 : f32
    %52 = vector.broadcast %cst_22 : f32 to vector<32x128xf32>
    %53 = arith.maximumf %51, %52 : vector<32x128xf32>
    %c0_23 = arith.constant 0 : index
    %c0_24 = arith.constant 0 : index
    %54 = vector.load %arg6[%c0_23, %c0_24] : memref<32x128xf32, #tpu.memory_space<vmem>>, vector<32x128xf32>
    tpu.vector_store %arg6[%c0_23, %c0_24], %53 {strides = array<i32>} : memref<32x128xf32, #tpu.memory_space<vmem>>, vector<32x128xf32>,
    return
  }
  func.func @transform_0(%arg0: i32) -> (i32, i32) {
    %c0_i32 = arith.constant 0 : i32
    %c0_i32_0 = arith.constant 0 : i32
    return %arg0, %c0_i32 : i32, i32
  }
  func.func @transform_1(%arg0: i32) -> (i32, i32) {
    %c0_i32 = arith.constant 0 : i32
    %c0_i32_0 = arith.constant 0 : i32
    %c0_i32_1 = arith.constant 0 : i32
    return %c0_i32, %c0_i32_0 : i32, i32
  }
  func.func @transform_2(%arg0: i32) -> (i32, i32) {
    %c0_i32 = arith.constant 0 : i32
    %c0_i32_0 = arith.constant 0 : i32
    %c0_i32_1 = arith.constant 0 : i32
    return %c0_i32, %c0_i32_0 : i32, i32
  }
  func.func @transform_3(%arg0: i32) -> (i32, i32) {
    %c0_i32 = arith.constant 0 : i32
    %c0_i32_0 = arith.constant 0 : i32
    %c0_i32_1 = arith.constant 0 : i32
    return %c0_i32, %c0_i32_0 : i32, i32
  }
  func.func @transform_4(%arg0: i32) -> (i32, i32) {
    %c0_i32 = arith.constant 0 : i32
    %c0_i32_0 = arith.constant 0 : i32
    %c0_i32_1 = arith.constant 0 : i32
    return %c0_i32, %c0_i32_0 : i32, i32
  }
  func.func @transform_5(%arg0: i32) -> (i32, i32) {
    %c0_i32 = arith.constant 0 : i32
    %c0_i32_0 = arith.constant 0 : i32
    return %arg0, %c0_i32 : i32, i32
  }
}

</mosaic_0001>

<bundles_post_ra>
// kernel: tpu_custom_call.1
= control target key start
LH: loop header
LB: loop body
LE: loop exit
PB: predicated region body
PF: predicated region fallthrough
CT: control target
= control target key end

     0   :  { %10 = vsyncpa [#allocation3], 0  ;;  %s1398_s0 = inlined_call_operand.hbm [shape: bf16[32,128], index: 0, kind: input, shape index: {}]   ;;  %s1399_s1 = inlined_call_operand.hbm [shape: bf16[384,128], index: 1, kind: input, shape index: {}]   ;;  %s1400_s2 = inlined_call_operand.hbm [shape: bf16[384,128], index: 2, kind: input, shape index: {}]   ;;  %s1401_s3 = inlined_call_operand.vmem [shape: f32[1,128], index: 3, kind: input, shape index: {}]   ;;  %s1402_s4 = inlined_call_operand.vmem [shape: f32[1,128], index: 4, kind: input, shape index: {}]   ;;  %s1403_s5 = inlined_call_operand.hbm [shape: f32[32,128], index: 5, kind: output, shape index: {}]  }
   0x1   :  { %11 = vsyncpa [#allocation6], 0 }
   0x2   :  { %12 = vsyncpa [#allocation4], 0  ;;  %s1169_s18 = smov [#allocation5]   ;;  %s1170_s20 = smov [#allocation2]  }
   0x3   :  { %s30_s19 = sshll.u32 %s1169_s18, 4  ;;  %s18_s21 = sshll.u32 %s1170_s20, 4  ;;  %s31_s19 = int_to_ptr.vmem [resolvable:$true] %s30_s19  ;;  %s1208_s21 = int_to_ptr.vmem [resolvable:$true] %s18_s21 }
   0x4   :  { %s1075_s24 = scalar_lea.hbm %s1399_s1, 3072 }
   0x5   :  { %p1076_p0 = scmp.ne.s32.totalorder %s1399_s1, %s1075_s24  ;;  %p1079_p1 = scmp.lt.u32.totalorder %s1075_s24, %s1399_s1 }
   0x7   :  { %p1081_p2 = pnand %p1079_p1, %p1076_p0 }
   0x9   :  { %1084 = shalt.err (!%p1081_p2)
}
   0xa   :  { %s1085_s29 = scalar_lea.vmem %s31_s19, 3072  ;;  %p1090_p4 = scmp.lt.s32.totalorder %s31_s19, %s31_s19 }
   0xb   :  { %p1086_p3 = scmp.ne.s32.totalorder %s31_s19, %s1085_s29  ;;  %p1091_p5 = scmp.lt.s32.totalorder %s1085_s29, %s1085_s29 }
   0xd   :  { %p1092_p6 = por %p1091_p5, %p1090_p4 }
   0xf   :  { %p1093_p7 = pnand %p1092_p6, %p1086_p3 }
  0x11   :  { %1096 = shalt.err (!%p1093_p7)
}
  0x12   :  { %s1171_s30 = smov 64   ;;  %s1172_s6 = smov 4  }
  0x13   :  { %36 = dma.hbm_to_vmem [thread:$0]  %s1399_s1, 3072, %s31_s19, [#allocation6], %s1171_s30, %s1171_s30, %s1172_s6  }
  0x14   :  { %s1097_s11 = scalar_lea.hbm %s1398_s0, 256 }
  0x15   :  { %p1098_p8 = scmp.ne.s32.totalorder %s1398_s0, %s1097_s11  ;;  %p1101_p9 = scmp.lt.u32.totalorder %s1097_s11, %s1398_s0 }
  0x17   :  { %p1103_p10 = pnand %p1101_p9, %p1098_p8 }
  0x19   :  { %1106 = shalt.err (!%p1103_p10)
}
  0x1a   :  { %s1107_s16 = scalar_lea.vmem %s1208_s21, 256  ;;  %p1112_p12 = scmp.lt.s32.totalorder %s1208_s21, %s1208_s21 }
  0x1b   :  { %p1108_p11 = scmp.ne.s32.totalorder %s1208_s21, %s1107_s16  ;;  %p1113_p13 = scmp.lt.s32.totalorder %s1107_s16, %s1107_s16 }
  0x1d   :  { %p1114_p0 = por %p1113_p13, %p1112_p12 }
  0x1f   :  { %p1115_p1 = pnand %p1114_p0, %p1108_p11 }
  0x21   :  { %1118 = shalt.err (!%p1115_p1)
}
  0x22   :  { %24 = dma.hbm_to_vmem [thread:$0]  %s1398_s0, 256, %s1208_s21, [#allocation3], %s1171_s30, %s1171_s30, %s1172_s6  }
  0x23   :  { %s1173_s18 = smov [#allocation7]   ;;  %s1119_s23 = scalar_lea.hbm %s1400_s2, 3072 }
  0x24   :  { %s42_s19 = sshll.u32 %s1173_s18, 4  ;;  %p1120_p2 = scmp.ne.s32.totalorder %s1400_s2, %s1119_s23  ;;  %s43_s19 = int_to_ptr.vmem [resolvable:$true] %s42_s19 }
  0x25   :  { %p1123_p3 = scmp.lt.u32.totalorder %s1119_s23, %s1400_s2 }
  0x27   :  { %p1125_p4 = pnand %p1123_p3, %p1120_p2 }
  0x29   :  { %1128 = shalt.err (!%p1125_p4)
}
  0x2a   :  { %s1129_s28 = scalar_lea.vmem %s43_s19, 3072  ;;  %p1134_p6 = scmp.lt.s32.totalorder %s43_s19, %s43_s19 }
  0x2b   :  { %p1130_p5 = scmp.ne.s32.totalorder %s43_s19, %s1129_s28  ;;  %p1135_p7 = scmp.lt.s32.totalorder %s1129_s28, %s1129_s28 }
  0x2d   :  { %p1136_p8 = por %p1135_p7, %p1134_p6 }
  0x2f   :  { %p1137_p9 = pnand %p1136_p8, %p1130_p5 }
  0x31   :  { %1140 = shalt.err (!%p1137_p9)
}
  0x32   :  { %48 = dma.hbm_to_vmem [thread:$0]  %s1400_s2, 3072, %s43_s19, [#allocation6], %s1171_s30, %s1171_s30, %s1172_s6  }
  0x33   :  { %1163 = dma.done.wait [#allocation3], 256  }
  0x34   :  { %1164 = vsyncadd [#allocation3], 4294967040 }
  0x35   :  { %1165 = dma.done.wait [#allocation6], 6144  }
  0x36   :  { %1166 = vsyncadd [#allocation6], 4294961152  ;;  %v1023_v0 = vld [vmem:[#allocation5 + $0x40] sm:$0xff]   ;;  %v1025_v2 = vld [vmem:[#allocation5 + $0x48] sm:$0xff]   ;;  %v71_v8 = vlaneseq  ;;  %vm1174_vm6 = vmmov 1  }
  0x37   :  { %v1024_v1 = vld [vmem:[#allocation5] sm:$0xff]   ;;  %898 = vmatprep.subr.bf16.mxu0 %v1023_v0  ;;  %v1027_v4 = vld [vmem:[#allocation5 + $0x8] sm:$0xff]   ;;  %v1028_v5 = vld [vmem:[#allocation5 + $0x50] sm:$0xff]  }
  0x38   :  { %899 = vmatpush3.bf16.msra.mxu0 %v1024_v1  ;;  %v1026_v3 = vld [vmem:[#allocation5 + $0x80] sm:$0xff]   ;;  %v1029_v6 = vld [vmem:[#allocation5 + $0x88] sm:$0xff]   ;;  %v1030_v7 = vld [vmem:[#allocation5 + $0x10] sm:$0xff]   ;;  %v1260_v13 = vshrl.u32 %v71_v8, 7 }
  0x39   :  { %900 = vmatprep.subr.bf16.mxu0 %v1025_v2  ;;  %974 = vmatprep.subr.bf16.mxu1 %v1026_v3  ;;  %v1031_v9 = vld [vmem:[#allocation5 + $0x58] sm:$0xff]   ;;  %v1032_v10 = vld [vmem:[#allocation5 + $0x90] sm:$0xff]   ;;  %v1034_v12 = vld [vmem:[#allocation5 + $0x60] sm:$0xff]  }
  0x3a   :  { %975 = vmatpush3.bf16.msra.mxu1 %v1026_v3  ;;  %v1033_v11 = vld [vmem:[#allocation5 + $0x18] sm:$0xff]   ;;  %v1036_v15 = vld [vmem:[#allocation5 + $0x20] sm:$0xff]   ;;  %v73_v17 = vadd.s32 8, %v1260_v13  ;;  %v1037_v18 = vld [vmem:[#allocation5 + $0x68] sm:$0xff]   ;;  %v75_v19 = vadd.s32 24, %v1260_v13  ;;  %v74_v20 = vadd.s32 16, %v1260_v13 }
  0x3b   :  { %976 = vmatprep.subr.bf16.mxu1 %v1029_v6  ;;  %v1035_v14 = vld [vmem:[#allocation5 + $0x98] sm:$0xff]   ;;  %v1038_v16 = vld [vmem:[#allocation5 + $0xa0] sm:$0xff]   ;;  %v1039_v21 = vld [vmem:[#allocation5 + $0x28] sm:$0xff]   ;;  %v80_v22 = vand.u32 15, %v1260_v13  ;;  %vm136_vm0 = vcmp.lt.s32.totalorder %v1260_v13, 1  ;;  %vm149_vm3 = vcmp.lt.s32.totalorder %v1260_v13, 7 }
  0x3c   :  { %901 = vmatpush3.bf16.msra.mxu0 %v1027_v4  ;;  %v1041_v23 = vld [vmem:[#allocation5 + $0xa8] sm:$0xff]   ;;  %v87_v24 = vand.u32 15, %v73_v17  ;;  %v1040_v25 = vld [vmem:[#allocation5 + $0x70] sm:$0xff]   ;;  %v101_v26 = vand.u32 15, %v75_v19  ;;  %v94_v27 = vand.u32 15, %v74_v20  ;;  %v66_v31 = vld [vmem:[#allocation2 + $0x8] sm:$0xff]  }
  0x3d   :  { %902 = vmatprep.subr.bf16.mxu0 %v1028_v5  ;;  %v1042_v28 = vld [vmem:[#allocation5 + $0x30] sm:$0xff]   ;;  %vm1267_vm1 = vcmp.gt.s32.totalorder %v80_v22, 0  ;;  %v1043_v34 = vld [vmem:[#allocation5 + $0x78] sm:$0xff]   ;;  %v1280_v37 = vunpack.c.h.bf16 %v66_v31  ;;  %v1282_v38 = vunpack.c.l.bf16 %v66_v31  ;;  %v1049_v52 = vld [vmem:[#allocation7 + $0x40] sm:$0xff]  }
  0x3e   :  { %977 = vmatpush3.bf16.msra.mxu1 %v1029_v6  ;;  %v1044_v29 = vld [vmem:[#allocation5 + $0xb0] sm:$0xff]   ;;  %vm1271_vm2 = vcmp.lt.s32.totalorder %v87_v24, 15  ;;  %vm1284_vm4 = vcmp.lt.s32.totalorder %v101_v26, 15  ;;  %vm1288_vm5 = vcmp.gt.s32.totalorder %v94_v27, 0  ;;  %v1045_v41 = vld [vmem:[#allocation5 + $0x38] sm:$0xff]   ;;  %vm1299_vm7 = vmpackc.low %vm1174_vm6, %vm1267_vm1 }
  0x3f   :  { %978 = vmatprep.subr.bf16.mxu1 %v1032_v10  ;;  %v63_v30 = vld [vmem:[#allocation2] sm:$0xff]   ;;  %v1047_v47 = vld [vmem:[#allocation5 + $0xb8] sm:$0xff]   ;;  %v135_v48 = vrot.slane %v1280_v37, 7  ;;  %v147_v49 = vrot.slane %v1282_v38, 1  ;;  %vm1308_vm8 = vmpackc.low %vm1271_vm2, %vm1174_vm6  ;;  %v148_v51 = vrot.slane %v1280_v37, 1  ;;  %v134_v63 = vrot.slane %v1282_v38, 7 }
  0x40   :  { %903 = vmatpush3.bf16.msra.mxu0 %v1030_v7  ;;  %v1276_v35 = vunpack.c.l.bf16 %v63_v30  ;;  %v1278_v36 = vunpack.c.h.bf16 %v63_v30  ;;  %395 = vmatprep.mubr.bf16.mxu0 %v63_v30  ;;  %vm1324_vm9 = vmpackc.low %vm1284_vm4, %vm1174_vm6  ;;  %v1050_v62 = vld [vmem:[#allocation7 + $0x80] sm:$0xff]   ;;  %v1052_v2 = vld [vmem:[#allocation7 + $0x48] sm:$0xff]  }
  0x41   :  { %904 = vmatprep.subr.bf16.mxu0 %v1031_v9  ;;  %v150_v60 = vsel %vm149_vm3, %v147_v49, %v148_v51  ;;  %vm1336_vm10 = vmpackc.low %vm1174_vm6, %vm1288_vm5  ;;  %v1051_v1 = vld [vmem:[#allocation7] sm:$0xff]   ;;  %v1053_v4 = vld [vmem:[#allocation7 + $0x88] sm:$0xff]   ;;  %v137_v6 = vsel %vm136_vm0, %v134_v63, %v135_v48 }
  0x42   :  { %979 = vmatpush3.bf16.msra.mxu1 %v1032_v10  ;;  %v132_v42 = vrot.slane %v1276_v35, 7  ;;  %v133_v43 = vrot.slane %v1278_v36, 7  ;;  %v145_v44 = vrot.slane %v1276_v35, 1  ;;  %v146_v45 = vrot.slane %v1278_v36, 1  ;;  %v1054_v5 = vld [vmem:[#allocation7 + $0x8] sm:$0xff]   ;;  %v1055_v9 = vld [vmem:[#allocation7 + $0x50] sm:$0xff]  }
  0x43   :  { %980 = vmatprep.subr.bf16.mxu1 %v1035_v14  ;;  %v1056_v10 = vld [vmem:[#allocation7 + $0x90] sm:$0xff]   ;;  %v1062_v17 = vld [vmem:[#allocation7 + $0xa0] sm:$0xff]   ;;  %v1064_v19 = vld [vmem:[#allocation7 + $0x68] sm:$0xff]  }
  0x44   :  { %905 = vmatpush3.bf16.msra.mxu0 %v1033_v11  ;;  %v139_v53 = vsel %vm136_vm0, %v132_v42, %v133_v43  ;;  %v152_v54 = vsel %vm149_vm3, %v145_v44, %v146_v45  ;;  %v140_v55 = vsel %vm136_vm0, %v135_v48, %v132_v42  ;;  %v151_v56 = vsel %vm149_vm3, %v146_v45, %v147_v49  ;;  %v1057_v11 = vld [vmem:[#allocation7 + $0x10] sm:$0xff]   ;;  %v1065_v20 = vld [vmem:[#allocation7 + $0xa8] sm:$0xff]   ;;  %v1071_v26 = vld [vmem:[#allocation7 + $0xb8] sm:$0xff]  }
  0x45   :  { %906 = vmatprep.subr.bf16.mxu0 %v1034_v12  ;;  %v850_v58 = vpack.c.bf16 %v139_v53, %v140_v55  ;;  %v856_v59 = vpack.c.bf16 %v151_v56, %v152_v54  ;;  %v153_v61 = vsel %vm149_vm3, %v148_v51, %v145_v44  ;;  %v138_v7 = vsel %vm136_vm0, %v133_v43, %v134_v63  ;;  %v1058_v12 = vld [vmem:[#allocation7 + $0x58] sm:$0xff]   ;;  %v1067_v22 = vld [vmem:[#allocation7 + $0x70] sm:$0xff]  }
  0x46   :  { %981 = vmatpush3.bf16.msra.mxu1 %v1035_v14  ;;  %v859_v3 = vpack.c.bf16 %v153_v61, %v150_v60  ;;  %v853_v8 = vpack.c.bf16 %v137_v6, %v138_v7  ;;  %v1059_v14 = vld [vmem:[#allocation7 + $0x98] sm:$0xff]   ;;  %v1069_v24 = vld [vmem:[#allocation7 + $0x30] sm:$0xff]  }
  0x47   :  { %982 = vmatprep.subr.bf16.mxu1 %v1038_v16  ;;  %990 = vmatprep.mubr.msk.bf16.mxu1 %vm1308_vm8, %v856_v59  ;;  %v1072_v27 = vld [vmem:[#allocation7 + $0x38] sm:$0xff]   ;;  %v824_v30 = vld [vmem:[%s1401_s3] ss:$0 sm:$0xff] }
  0x48   :  { %907 = vmatpush3.bf16.msra.mxu0 %v1036_v15  ;;  %v1060_v15 = vld [vmem:[#allocation7 + $0x18] sm:$0xff]   ;;  %v861_v50 = vld [vmem:[%s1402_s4] ss:$0 sm:$0xff]  ;;  %s1175_s4 = smov [#allocation8]  }
  0x49   :  { %908 = vmatprep.subr.bf16.mxu0 %v1037_v18  ;;  %v1063_v18 = vld [vmem:[#allocation7 + $0x20] sm:$0xff]   ;;  %s809_s6 = sshll.u32 %s1175_s4, 4  ;;  %s810_s6 = int_to_ptr.vmem [resolvable:$true] %s809_s6 }
  0x4a   :  { %983 = vmatpush3.bf16.msra.mxu1 %v1038_v16  ;;  %v1061_v16 = vld [vmem:[#allocation7 + $0x60] sm:$0xff]   ;;  %s1141_s7 = scalar_lea.vmem %s810_s6, 512  ;;  %p1146_p11 = scmp.lt.s32.totalorder %s810_s6, %s810_s6 }
  0x4b   :  { %984 = vmatprep.subr.bf16.mxu1 %v1041_v23  ;;  %p1142_p10 = scmp.ne.s32.totalorder %s810_s6, %s1141_s7  ;;  %p1147_p12 = scmp.lt.s32.totalorder %s1141_s7, %s1141_s7 }
  0x4c   :  { %909 = vmatpush3.bf16.msra.mxu0 %v1039_v21  ;;  %v1066_v21 = vld [vmem:[#allocation7 + $0x28] sm:$0xff]  }
  0x4d   :  { %910 = vmatprep.subr.bf16.mxu0 %v1040_v25  ;;  %v1070_v25 = vld [vmem:[#allocation7 + $0x78] sm:$0xff]   ;;  %p1148_p13 = por %p1147_p12, %p1146_p11 }
  0x4e   :  { %985 = vmatpush3.bf16.msra.mxu1 %v1041_v23  ;;  %v1068_v23 = vld [vmem:[#allocation7 + $0xb0] sm:$0xff]  }
  0x4f   :  { %986 = vmatprep.subr.bf16.mxu1 %v1044_v29  ;;  %p1149_p0 = pnand %p1148_p13, %p1142_p10 }
  0x50   :  { %911 = vmatpush3.bf16.msra.mxu0 %v1042_v28 }
  0x51   :  { %912 = vmatprep.subr.bf16.mxu0 %v1043_v34 }
  0x52   :  { %987 = vmatpush3.bf16.msra.mxu1 %v1044_v29 }
  0x53   :  { %988 = vmatprep.subr.bf16.mxu1 %v1047_v47 }
  0x54   :  { %913 = vmatpush3.bf16.msra.mxu0 %v1045_v41 }
  0x55   :  { %936 = vmatprep.subr.bf16.mxu0 %v1049_v52 }
  0x56   :  { %989 = vmatpush3.bf16.msra.mxu1 %v1047_v47 }
  0x57   :  { %851 = vmatmul.mubr.msk.bf16.vlgmr.msra.gmra.mrb[0].mxu0 %vm1299_vm7, %v850_v58  ;;  %994 = vmatprep.subr.bf16.mxu1 %v1050_v62 }
  0x58   :  { %403 = vmatprep.mubr.bf16.mxu0 %v66_v31  ;;  %937 = vmatpush3.bf16.msra.mxu0 %v1051_v1 }
  0x59   :  { %991 = vmatmul.mubr.msk.bf16.vlgmr.msra.gmra.mrb[0].mxu1 %vm1324_vm9, %v859_v3  ;;  %938 = vmatprep.subr.bf16.mxu0 %v1052_v2 }
  0x5a   :  { %995 = vmatpush3.bf16.msra.mxu1 %v1050_v62 }
  0x5b   :  { %996 = vmatprep.subr.bf16.mxu1 %v1053_v4 }
  0x5c   :  { %939 = vmatpush3.bf16.msra.mxu0 %v1054_v5 }
  0x5d   :  { %940 = vmatprep.subr.bf16.mxu0 %v1055_v9 }
  0x5e   :  { %997 = vmatpush3.bf16.msra.mxu1 %v1053_v4 }
  0x5f   :  { %854 = vmatmul.mubr.msk.bf16.gmra.mrb[4].mxu0 %vm1336_vm10, %v853_v8  ;;  %998 = vmatprep.subr.bf16.mxu1 %v1056_v10 }
  0x60   :  { %941 = vmatpush3.bf16.msra.mxu0 %v1057_v11 }
  0x61   :  { %942 = vmatprep.subr.bf16.mxu0 %v1058_v12 }
  0x62   :  { %999 = vmatpush3.bf16.msra.mxu1 %v1056_v10 }
  0x63   :  { %1000 = vmatprep.subr.bf16.mxu1 %v1059_v14 }
  0x64   :  { %943 = vmatpush3.bf16.msra.mxu0 %v1060_v15 }
  0x65   :  { %944 = vmatprep.subr.bf16.mxu0 %v1061_v16 }
  0x66   :  { %1001 = vmatpush3.bf16.msra.mxu1 %v1059_v14 }
  0x67   :  { %1002 = vmatprep.subr.bf16.mxu1 %v1062_v17 }
  0x68   :  { %945 = vmatpush3.bf16.msra.mxu0 %v1063_v18 }
  0x69   :  { %946 = vmatprep.subr.bf16.mxu0 %v1064_v19 }
  0x6a   :  { %1003 = vmatpush3.bf16.msra.mxu1 %v1062_v17 }
  0x6b   :  { %1004 = vmatprep.subr.bf16.mxu1 %v1065_v20 }
  0x6c   :  { %947 = vmatpush3.bf16.msra.mxu0 %v1066_v21 }
  0x6d   :  { %948 = vmatprep.subr.bf16.mxu0 %v1067_v22 }
  0x6e   :  { %1005 = vmatpush3.bf16.msra.mxu1 %v1065_v20 }
  0x6f   :  { %1006 = vmatprep.subr.bf16.mxu1 %v1068_v23 }
  0x70   :  { %949 = vmatpush3.bf16.msra.mxu0 %v1069_v24 }
  0x71   :  { %950 = vmatprep.subr.bf16.mxu0 %v1070_v25 }
  0x72   :  { %1007 = vmatpush3.bf16.msra.mxu1 %v1068_v23 }
  0x73   :  { %1008 = vmatprep.subr.bf16.mxu1 %v1071_v26 }
  0x74   :  { %951 = vmatpush3.bf16.msra.mxu0 %v1072_v27 }
  0x76   :  { %1009 = vmatpush3.bf16.msra.mxu1 %v1071_v26 }
 0x12a   :  { %v914_v28 = vpop.f32.mrb[0].mxu0 }
 0x12b   :  { %v915_v29 = vpop.f32.mrb[1].mxu0 }
 0x12c   :  { %v916_v31 = vadd.f32 %v915_v29, %v914_v28  ;;  %v917_v32 = vpop.f32.mrb[2].mxu0  ;;  %v992_v34 = vpop.f32.mrb[0].mxu1 }
 0x12d   :  { %v918_v33 = vpop.f32.mrb[3].mxu0  ;;  %v446_v41 = vpop.f32.mrb[1].mxu1 }
 0x12e   :  { %v919_v39 = vadd.f32 %v918_v33, %v917_v32  ;;  %v398_v40 = vadd.f32 %v916_v31, %v824_v30  ;;  %v993_v42 = vpop.f32.mrb[2].mxu1 }
 0x12f   :  { %v449_v45 = vpop.f32.mrb[3].mxu1 }
 0x130   :  { %v447_v43 = vadd.f32 %v446_v41, %v398_v40  ;;  %v401_v44 = vadd.f32 %v919_v39, %v824_v30 }
 0x132   :  { %v461_v47 = vmax.f32 %v447_v43, 0.0  ;;  %v450_v48 = vadd.f32 %v449_v45, %v401_v44  ;;  %v920_v49 = vpop.f32.mrb[4].mxu0 }
 0x133   :  { %v921_v51 = vpop.f32.mrb[5].mxu0 }
 0x134   :  { %v462_v52 = vmax.f32 %v450_v48, 0.0  ;;  %v922_v53 = vadd.f32 %v921_v51, %v920_v49  ;;  %v923_v54 = vpop.f32.mrb[6].mxu0  ;;  %v465_v55 = vrot.slane %v461_v47, 7  ;;  %v477_v56 = vrot.slane %v461_v47, 1 }
 0x135   :  { %v924_v58 = vpop.f32.mrb[7].mxu0 }
 0x136   :  { %v466_v59 = vrot.slane %v462_v52, 7  ;;  %v478_v60 = vrot.slane %v462_v52, 1  ;;  %v406_v61 = vadd.f32 %v922_v53, %v824_v30  ;;  %v925_v62 = vadd.f32 %v924_v58, %v923_v54 }
 0x137   :  { %v490_v63 = vpack.c.bf16 %v462_v52, %v461_v47 }
 0x138   :  { %v471_v1 = vsel %vm136_vm0, %v465_v55, %v466_v59  ;;  %v455_v2 = vadd.f32 %v992_v34, %v406_v61  ;;  %v409_v3 = vadd.f32 %v925_v62, %v824_v30  ;;  %v483_v4 = vsel %vm149_vm3, %v477_v56, %v478_v60 }
 0x139   :  { %726 = vmatprep.mubr.bf16.mxu0 %v490_v63 }
 0x13a   :  { %v463_v5 = vmax.f32 %v455_v2, 0.0  ;;  %v458_v6 = vadd.f32 %v993_v42, %v409_v3 }
 0x13c   :  { %v467_v7 = vrot.slane %v463_v5, 7  ;;  %v479_v8 = vrot.slane %v463_v5, 1  ;;  %v464_v9 = vmax.f32 %v458_v6, 0.0 }
 0x13e   :  { %v468_v10 = vrot.slane %v464_v9, 7  ;;  %v480_v11 = vrot.slane %v464_v9, 1  ;;  %v482_v12 = vsel %vm149_vm3, %v478_v60, %v479_v8  ;;  %v493_v14 = vpack.c.bf16 %v464_v9, %v463_v5 }
 0x13f   :  { %v893_v15 = vpack.c.bf16 %v482_v12, %v483_v4  ;;  %v470_v16 = vsel %vm136_vm0, %v466_v59, %v467_v7 }
 0x140   :  { %v472_v17 = vsel %vm136_vm0, %v468_v10, %v465_v55  ;;  %v481_v18 = vsel %vm149_vm3, %v479_v8, %v480_v11  ;;  %v484_v19 = vsel %vm149_vm3, %v480_v11, %v477_v56  ;;  %v469_v20 = vsel %vm136_vm0, %v467_v7, %v468_v10 }
 0x141   :  { %v887_v21 = vpack.c.bf16 %v471_v1, %v472_v17  ;;  %1010 = vmatprep.mubr.msk.bf16.mxu1 %vm1308_vm8, %v893_v15  ;;  %v896_v22 = vpack.c.bf16 %v484_v19, %v481_v18  ;;  %v890_v23 = vpack.c.bf16 %v469_v20, %v470_v16 }
 0x143   :  { %888 = vmatmul.mubr.msk.bf16.vlgmr.msra.gmra.mrb[8].mxu0 %vm1299_vm7, %v887_v21  ;;  %1011 = vmatmul.mubr.msk.bf16.vlgmr.msra.gmra.mrb[4].mxu1 %vm1324_vm9, %v896_v22 }
 0x144   :  { %734 = vmatprep.mubr.bf16.mxu0 %v493_v14 }
 0x14b   :  { %891 = vmatmul.mubr.msk.bf16.gmra.mrb[12].mxu0 %vm1336_vm10, %v890_v23 }
 0x216   :  { %v952_v24 = vpop.f32.mrb[8].mxu0  ;;  %v1012_v25 = vpop.f32.mrb[4].mxu1 }
 0x217   :  { %v953_v13 = vpop.f32.mrb[9].mxu0  ;;  %v777_v26 = vpop.f32.mrb[5].mxu1 }
 0x218   :  { %v954_v27 = vadd.f32 %v953_v13, %v952_v24  ;;  %v955_v28 = vpop.f32.mrb[10].mxu0  ;;  %v1013_v29 = vpop.f32.mrb[6].mxu1 }
 0x219   :  { %v956_v46 = vpop.f32.mrb[11].mxu0  ;;  %v780_v30 = vpop.f32.mrb[7].mxu1 }
 0x21a   :  { %v729_v31 = vadd.f32 %v954_v27, %v861_v50  ;;  %v957_v57 = vadd.f32 %v956_v46, %v955_v28 }
 0x21c   :  { %v778_v32 = vadd.f32 %v777_v26, %v729_v31  ;;  %v732_v33 = vadd.f32 %v957_v57, %v861_v50 }
 0x21e   :  { %v792_v0 = vadd.f32 %v778_v32, %v1276_v35  ;;  %v781_v34 = vadd.f32 %v780_v30, %v732_v33  ;;  %v958_v39 = vpop.f32.mrb[12].mxu0 }
 0x21f   :  { %v959_v40 = vpop.f32.mrb[13].mxu0 }
 0x220   :  { %v796_v41 = vmax.f32 %v792_v0, 0.0  ;;  %v793_v42 = vadd.f32 %v781_v34, %v1278_v36  ;;  %v960_v43 = vadd.f32 %v959_v40, %v958_v39  ;;  %v961_v44 = vpop.f32.mrb[14].mxu0 }
 0x221   :  { %v962_v45 = vpop.f32.mrb[15].mxu0 }
 0x222   :  { %800 = vst [vmem:[#allocation8] sm:$0xff] %v796_v41  ;;  %v797_v47 = vmax.f32 %v793_v42, 0.0  ;;  %v737_v48 = vadd.f32 %v960_v43, %v861_v50  ;;  %v963_v49 = vadd.f32 %v962_v45, %v961_v44 }
 0x224   :  { %801 = vst [vmem:[#allocation8 + $0x8] sm:$0xff] %v797_v47  ;;  %v786_v51 = vadd.f32 %v1012_v25, %v737_v48  ;;  %v740_v52 = vadd.f32 %v963_v49, %v861_v50 }
 0x226   :  { %v794_v53 = vadd.f32 %v786_v51, %v1282_v38  ;;  %v789_v54 = vadd.f32 %v1013_v29, %v740_v52 }
 0x228   :  { %v798_v35 = vmax.f32 %v794_v53, 0.0  ;;  %v795_v55 = vadd.f32 %v789_v54, %v1280_v37 }
 0x22a   :  { %802 = vst [vmem:[#allocation8 + $0x10] sm:$0xff] %v798_v35  ;;  %v799_v36 = vmax.f32 %v795_v55, 0.0 }
 0x22c   :  { %803 = vst [vmem:[#allocation8 + $0x18] sm:$0xff] %v799_v36 }
 0x22d   :  { %1152 = shalt.err (!%p1149_p0)
}
 0x22e   :  { %s1153_s10 = scalar_lea.hbm %s1403_s5, 512 }
 0x22f   :  { %p1154_p1 = scmp.ne.s32.totalorder %s1403_s5, %s1153_s10  ;;  %p1157_p2 = scmp.lt.u32.totalorder %s1153_s10, %s1403_s5 }
 0x231   :  { %p1159_p3 = pnand %p1157_p2, %p1154_p1 }
 0x233   :  { %1162 = shalt.err (!%p1159_p3)
}
 0x234   :  { %s1176_s15 = smov 128   ;;  %s1177_s16 = smov 8  }
 0x235   :  { %815 = dma.vmem_to_hbm [thread:$0]  %s810_s6, 512, %s1403_s5, [#allocation4], %s1176_s15, %s1176_s15, %s1177_s16  }
 0x236   :  { %1167 = dma.done.wait [#allocation4], 512  }
 0x237   :  { %1168 = vsyncadd [#allocation4], 4294966784 }
 0x238   :  { %819 = vsyncpa [#allocation3], 1 }
 0x239   :  { %820 = vsyncpa [#allocation6], 1 }
 0x23a   :  { %821 = vsyncpa [#allocation4], 1 }

</bundles_post_ra>
